<compile_context>
chip_gen: v7x
topology: tpu7x:2x2x1
jax: 0.10.0
libtpu: 0.0.40
codegen_flags: <defaults>
</compile_context>

<pallas_src>
import functools

import jax
import jax.numpy as jnp
from jax.experimental import pallas as pl
from jax.experimental.pallas import tpu as pltpu


# ----------------------------------------------------------------------------
# Kernel 1: fused style matmul  (all four WScaledLinear of the two AdaINs)
#   y = (x @ W_cat) * scale + b_cat
# ----------------------------------------------------------------------------
def _linear_kernel(x_ref, w_ref, b_ref, o_ref, *, scale):
    acc = jnp.dot(x_ref[...], w_ref[...], preferred_element_type=jnp.float32)
    o_ref[...] = (acc * scale + b_ref[...]).astype(o_ref.dtype)


def linear(x, w, b, *, scale):
    M = x.shape[0]
    N = w.shape[1]
    return pl.pallas_call(
        functools.partial(_linear_kernel, scale=scale),
        out_shape=jax.ShapeDtypeStruct((M, N), jnp.float32),
        in_specs=[pl.BlockSpec(memory_space=pltpu.MemorySpace.VMEM)] * 3,
        out_specs=pl.BlockSpec(memory_space=pltpu.MemorySpace.VMEM),
    )(x, w, b)


# ----------------------------------------------------------------------------
# Kernel 2: 1x1 weight-scaled conv (runs BEFORE the nearest-2x upsample; the two
#           operations commute exactly for nearest-neighbor interpolation)
# ----------------------------------------------------------------------------
def _pointwise_conv_kernel(x_ref, w_ref, b_ref, o_ref, *, wscale):
    acc = jnp.dot(x_ref[...], w_ref[...], preferred_element_type=jnp.float32)
    o_ref[...] = (acc * wscale + b_ref[...]).astype(o_ref.dtype)


def pointwise_conv(x_nhwc, w, b, *, scale):
    B, H, W, Cin = x_nhwc.shape
    Cout = w.shape[1]
    x_flat = x_nhwc.reshape(B, H * W, Cin).astype(jnp.bfloat16)
    out = pl.pallas_call(
        functools.partial(_pointwise_conv_kernel, wscale=scale),
        grid=(B,),
        in_specs=[
            pl.BlockSpec((None, H * W, Cin), lambda b_: (b_, 0, 0)),
            pl.BlockSpec((Cin, Cout), lambda b_: (0, 0)),
            pl.BlockSpec((1, Cout), lambda b_: (0, 0)),
        ],
        out_specs=pl.BlockSpec((None, H * W, Cout), lambda b_: (b_, 0, 0)),
        out_shape=jax.ShapeDtypeStruct((B, H * W, Cout), jnp.float32),
        compiler_params=pltpu.CompilerParams(
            dimension_semantics=("parallel",),
            vmem_limit_bytes=64 * 1024 * 1024),
    )(x_flat, w, b)
    return out.reshape(B, H, W, Cout)


# ----------------------------------------------------------------------------
# Kernel 3: 3x3 weight-scaled conv with fused epilogue
#   acc = sum_t  window_t @ W_t            (9 shifted windows read in-kernel)
#   y   = LeakyReLU(acc*wscale + bias)
#   y   = y + (nscale * noise_w) * noise    (noise injection)
#   y   = y * style_wf + style_b            (AdaIN; InstanceNorm is never applied
#                                            in the reference AdaIN.forward)
#
# The activation arrives zero-padded (1 top, 2 bottom rows; 1 left, 1 right col)
# and flattened row-major over (H+3, W+2).  The output is computed at padded
# width Wp = W+2 so that every tap is a single contiguous row-shifted slice:
#   tap (dy, dx)  ->  rows [dy*Wp + dx , dy*Wp + dx + H*Wp)  of the padded slab.
# The two garbage columns per output row are discarded by the wrapper.
# ----------------------------------------------------------------------------
_TAPS = ((0, 0), (0, 1), (0, 2), (1, 0), (1, 1), (1, 2), (2, 0), (2, 1), (2, 2))


def _conv3x3_fused_kernel(x_ref, w_ref, b_ref, nse_ref, nw_ref, swf_ref, sb_ref,
                          o_ref, *, wp, wscale, nscale, slope):
    m = o_ref.shape[0]                       # H * Wp  (padded-width output rows)
    cout = o_ref.shape[1]
    acc = jnp.zeros((m, cout), jnp.float32)
    for t, (dy, dx) in enumerate(_TAPS):     # unrolled MAC loop over kernel taps (MXU)
        off = dy * wp + dx                   # static row offset into padded slab
        xt = x_ref[pl.ds(off, m), :]         # (m, Cin) bf16 shifted window
        acc = acc + jnp.dot(xt, w_ref[t], preferred_element_type=jnp.float32)
    acc = acc * wscale + b_ref[...]                      # equalised-LR scale + bias
    acc = jnp.where(acc > 0, acc, slope * acc)           # LeakyReLU(0.2)
    acc = acc + (nscale * nw_ref[...]) * nse_ref[...]    # noise injection
    acc = acc * swf_ref[...] + sb_ref[...]               # AdaIN modulation
    o_ref[...] = acc.astype(o_ref.dtype)


def conv3x3_fused(x_nhwc, w_taps, b, noise, noise_w, swf, sb, *,
                  wscale, nscale, slope=0.2):
    B, H, W, Cin = x_nhwc.shape
    Cout = w_taps.shape[-1]
    Wp = W + 2                      # padded width
    R = (H + 3) * Wp                # padded slab rows (1 top + 2 bottom pad rows)
    M = H * Wp                      # padded-width output rows per batch element

    # zero-pad + flatten + bf16 cast (single fused wrapper pass over activations)
    xp = jnp.pad(x_nhwc, ((0, 0), (1, 2), (1, 1), (0, 0))).astype(jnp.bfloat16)
    xp = xp.reshape(B, R, Cin)
    # per-pixel noise, padded to the same Wp width and flattened
    nse = jnp.pad(noise, ((0, 0), (0, 0), (0, 2), (0, 0))).reshape(B, M, 1)
    swf3 = swf.reshape(B, 1, Cout)
    sb3 = sb.reshape(B, 1, Cout)
    nw = noise_w.reshape(1, Cout)

    tn = 256 if (Cout % 256 == 0) else Cout   # Cout tile (multiple of 128 or full)
    n_ct = Cout // tn

    kern = functools.partial(_conv3x3_fused_kernel, wp=Wp,
                             wscale=wscale, nscale=nscale, slope=slope)
    out = pl.pallas_call(
        kern,
        grid=(B, n_ct),
        in_specs=[
            pl.BlockSpec((None, R, Cin), lambda b_, j: (b_, 0, 0)),     # padded slab
            pl.BlockSpec((9, Cin, tn), lambda b_, j: (0, 0, j)),        # tap weights
            pl.BlockSpec((1, tn), lambda b_, j: (0, j)),                # bias
            pl.BlockSpec((None, M, 1), lambda b_, j: (b_, 0, 0)),       # noise
            pl.BlockSpec((1, tn), lambda b_, j: (0, j)),                # noise_w
            pl.BlockSpec((None, 1, tn), lambda b_, j: (b_, 0, j)),      # style_wf
            pl.BlockSpec((None, 1, tn), lambda b_, j: (b_, 0, j)),      # style_b
        ],
        out_specs=pl.BlockSpec((None, M, tn), lambda b_, j: (b_, 0, j)),
        out_shape=jax.ShapeDtypeStruct((B, M, Cout), jnp.float32),
        compiler_params=pltpu.CompilerParams(
            dimension_semantics=("parallel", "parallel"),
            vmem_limit_bytes=64 * 1024 * 1024),
    )(xp, w_taps, b, nse, nw, swf3, sb3)
    # drop the 2 garbage columns produced by the padded-width formulation
    return out.reshape(B, H, Wp, Cout)[:, :, :W, :]


# ----------------------------------------------------------------------------
# Kernel 4: standalone noise injection + AdaIN (only used by the `initial` branch,
#           where there is no preceding conv to fuse into)
# ----------------------------------------------------------------------------
def _noise_adain_kernel(x_ref, n_ref, nw_ref, swf_ref, sb_ref, o_ref, *, nscale):
    y = x_ref[...] + (nscale * nw_ref[...]) * n_ref[...]
    o_ref[...] = (y * swf_ref[...] + sb_ref[...]).astype(o_ref.dtype)


def noise_adain(x, noise, noise_w, swf, sb, *, nscale):
    B, H, W, C = x.shape
    nw = noise_w.reshape(1, 1, 1, C)
    swf4 = swf.reshape(B, 1, 1, C)
    sb4 = sb.reshape(B, 1, 1, C)
    return pl.pallas_call(
        functools.partial(_noise_adain_kernel, nscale=nscale),
        grid=(B,),
        in_specs=[
            pl.BlockSpec((1, H, W, C), lambda b_: (b_, 0, 0, 0)),
            pl.BlockSpec((1, H, W, 1), lambda b_: (b_, 0, 0, 0)),
            pl.BlockSpec((1, 1, 1, C), lambda b_: (0, 0, 0, 0)),
            pl.BlockSpec((1, 1, 1, C), lambda b_: (b_, 0, 0, 0)),
            pl.BlockSpec((1, 1, 1, C), lambda b_: (b_, 0, 0, 0)),
        ],
        out_specs=pl.BlockSpec((1, H, W, C), lambda b_: (b_, 0, 0, 0)),
        out_shape=jax.ShapeDtypeStruct((B, H, W, C), jnp.float32),
        compiler_params=pltpu.CompilerParams(dimension_semantics=("parallel",)),
    )(x, noise, nw, swf4, sb4)


# ----------------------------------------------------------------------------
# Gblock parameters (deterministic synthetic init, matching torch shapes/init).
# Matmul operands are stored bf16 (f32 accumulation in-kernel); biases stay f32.
# ----------------------------------------------------------------------------
def init_gblock_params(key, *, initial=False, ins=512, outs=512, w_dim=512, b_size=32):
    ks = jax.random.split(key, 8)
    p = dict(initial=initial, ins=ins, outs=outs, w_dim=w_dim)
    if initial:
        p["const"] = jnp.ones((b_size, 4, 4, ins), jnp.float32)          # NHWC const
        p["noise_scaler1"] = (2.0 / (4 * 4 * ins)) ** 0.5
    else:
        p["up_w"] = jax.random.normal(ks[0], (ins, ins), jnp.float32).astype(jnp.bfloat16)
        p["up_b"] = jnp.zeros((1, ins), jnp.float32)
        p["conv1_w"] = jax.random.normal(ks[1], (9, ins, outs), jnp.float32).astype(jnp.bfloat16)
        p["conv1_b"] = jnp.zeros((1, outs), jnp.float32)
        p["noise_scaler1"] = (2.0 / (3 * 3 * ins)) ** 0.5
    p["noise_w1"] = jnp.zeros((1, outs), jnp.float32)
    p["conv2_w"] = jax.random.normal(ks[2], (9, outs, outs), jnp.float32).astype(jnp.bfloat16)
    p["conv2_b"] = jnp.zeros((1, outs), jnp.float32)
    p["noise_scaler2"] = (2.0 / (3 * 3 * outs)) ** 0.5
    p["noise_w2"] = jnp.zeros((1, outs), jnp.float32)
    # AdaIN 1 & 2 style linears, pre-concatenated: [ada1_wf | ada1_b | ada2_wf | ada2_b]
    ada_ws = [jax.random.normal(ks[i], (w_dim, outs), jnp.float32) for i in (3, 4, 5, 6)]
    p["ada_wcat"] = jnp.concatenate(ada_ws, axis=1).astype(jnp.bfloat16)   # (w_dim, 4*outs)
    p["ada_bcat"] = jnp.zeros((1, 4 * outs), jnp.float32)
    return p


# ----------------------------------------------------------------------------
# Gblock.forward
# ----------------------------------------------------------------------------
def gblock_forward(p, x_nhwc, w_latent, noise1, noise2):
    ins, outs, w_dim = p["ins"], p["outs"], p["w_dim"]
    lin_scale = (2.0 / w_dim) ** 0.5          # WScaledLinear equalised-LR scale (lr_mul=1)

    # All four AdaIN style linears fused into one matmul, then split.
    styles = linear(w_latent.astype(jnp.bfloat16), p["ada_wcat"], p["ada_bcat"],
                    scale=lin_scale)                                  # (B, 4*outs)
    swf1, sb1, swf2, sb2 = jnp.split(styles, 4, axis=1)

    if p["initial"]:
        x = p["const"]                        # torch ignores the incoming x here
        x = noise_adain(x, noise1, p["noise_w1"], swf1, sb1,
                        nscale=p["noise_scaler1"])
    else:
        # Nearest-2x upsample and the 1x1 WScaledConv commute -> conv at low res first.
        up_scale = (2.0 / (1 * 1 * ins)) ** 0.5
        x = pointwise_conv(x_nhwc, p["up_w"], p["up_b"], scale=up_scale)
        x = jnp.repeat(jnp.repeat(x, 2, axis=1), 2, axis=2)           # (B, 2H, 2W, ins)
        # conv1 (3x3) + LeakyReLU + noise1 + AdaIN1, all fused in one kernel.
        c1_scale = (2.0 / (3 * 3 * ins)) ** 0.5
        x = conv3x3_fused(x, p["conv1_w"], p["conv1_b"], noise1, p["noise_w1"],
                          swf1, sb1, wscale=c1_scale, nscale=p["noise_scaler1"])

    # conv2 (3x3) + LeakyReLU + noise2 + AdaIN2, fused in one kernel.
    c2_scale = (2.0 / (3 * 3 * outs)) ** 0.5
    x = conv3x3_fused(x, p["conv2_w"], p["conv2_b"], noise2, p["noise_w2"],
                      swf2, sb2, wscale=c2_scale, nscale=p["noise_scaler2"])
    return x


if __name__ == "__main__":
    key = jax.random.PRNGKey(0)
    k_param, k_x, k_w, k_n1, k_n2 = jax.random.split(key, 5)

    B, ins, outs, H, W, w_dim = 2, 4, 4, 8, 8, 32
    params = init_gblock_params(k_param, initial=False, ins=ins, outs=outs, w_dim=w_dim)

    x = jax.random.normal(k_x, (B, H, W, ins), jnp.float32)        # NHWC input
    w_latent = jax.random.normal(k_w, (B, w_dim), jnp.float32)     # mapping-net latent
    # torch.randn noise (b, 1, 2H, 2W) -> NHWC (b, 2H, 2W, 1), generated host-side
    noise1 = jax.random.normal(k_n1, (B, 2 * H, 2 * W, 1), jnp.float32)
    noise2 = jax.random.normal(k_n2, (B, 2 * H, 2 * W, 1), jnp.float32)

    out = gblock_forward(params, x, w_latent, noise1, noise2)
    out = jax.block_until_ready(out)

    assert out.shape == (B, 2 * H, 2 * W, outs), out.shape
    assert bool(jnp.all(jnp.isfinite(out)))
    print("KERNEL_OK")
</pallas_src>

<mosaic_0001>
module attributes {stable_mosaic.version = 11 : i64} {
  func.func @_linear_kernel(%arg0: memref<2x32xbf16, #tpu.memory_space<vmem>>, %arg1: memref<32x16xbf16, #tpu.memory_space<vmem>>, %arg2: memref<1x16xf32, #tpu.memory_space<vmem>>, %arg3: memref<2x16xf32, #tpu.memory_space<vmem>>) attributes {dimension_semantics = [], scalar_prefetch = 0 : i64, scratch_operands = 0 : i64, tpu.core_type = #tpu.core_type<tc>} {
    %c0 = arith.constant 0 : index
    %c0_0 = arith.constant 0 : index
    %0 = vector.load %arg0[%c0, %c0_0] : memref<2x32xbf16, #tpu.memory_space<vmem>>, vector<2x32xbf16>
    %c0_1 = arith.constant 0 : index
    %c0_2 = arith.constant 0 : index
    %1 = vector.load %arg1[%c0_1, %c0_2] : memref<32x16xbf16, #tpu.memory_space<vmem>>, vector<32x16xbf16>
    %cst = arith.constant dense<0.000000e+00> : vector<2x16xf32>
    %2 = tpu.matmul %0, %1, %cst {dimension_numbers = #tpu.dot_dimension_numbers<[1], [0], [0], [1], [0, 0, 1, 1], [], []>} : vector<2x32xbf16>, vector<32x16xbf16>, vector<2x16xf32> -> vector<2x16xf32>
    %cst_3 = arith.constant 2.500000e-01 : f32
    %3 = vector.broadcast %cst_3 : f32 to vector<2x16xf32>
    %4 = arith.mulf %2, %3 : vector<2x16xf32>
    %c0_4 = arith.constant 0 : index
    %c0_5 = arith.constant 0 : index
    %5 = vector.load %arg2[%c0_4, %c0_5] : memref<1x16xf32, #tpu.memory_space<vmem>>, vector<1x16xf32>
    %6 = vector.broadcast %5 : vector<1x16xf32> to vector<2x16xf32>
    %7 = arith.addf %4, %6 : vector<2x16xf32>
    %c0_6 = arith.constant 0 : index
    %c0_7 = arith.constant 0 : index
    %8 = vector.load %arg3[%c0_6, %c0_7] : memref<2x16xf32, #tpu.memory_space<vmem>>, vector<2x16xf32>
    tpu.vector_store %arg3[%c0_6, %c0_7], %7 {strides = array<i32>} : memref<2x16xf32, #tpu.memory_space<vmem>>, vector<2x16xf32>,
    return
  }
}

</mosaic_0001>

<bundles_post_ra>
// kernel: tpu_custom_call.1
= control target key start
LH: loop header
LB: loop body
LE: loop exit
PB: predicated region body
PF: predicated region fallthrough
CT: control target
= control target key end

     0   :  { %v146_v1 = vmov 0.0   ;;  %vm147_vm0 = vmmov 0   ;;  %s193_s0 = inlined_call_operand.vmem [shape: bf16[2,32], index: 0, kind: input, shape index: {}]   ;;  %s194_s1 = inlined_call_operand.vmem [shape: bf16[32,16], index: 1, kind: input, shape index: {}]   ;;  %s195_s2 = inlined_call_operand.vmem [shape: f32[1,16], index: 2, kind: input, shape index: {}]   ;;  %s196_s3 = inlined_call_operand.hbm [shape: f32[2,16], index: 3, kind: output, shape index: {}]  }
   0x1   :  { %v120_v0 = vld [vmem:[%s194_s1] sm:$0xff]   ;;  %109 = vmatprep.subr.bf16.mxu0 %v146_v1  ;;  %v121_v2 = vld [vmem:[%s194_s1 + $0x8] sm:$0xff]   ;;  %113 = vmatprep.mubr.msk.bf16.mxu0 %vm147_vm0, %v146_v1 }
   0x2   :  { %110 = vmatpush3.bf16.msra.mxu0 %v120_v0 }
   0x3   :  { %8 = vsyncpa [#allocation3], 0  ;;  %111 = vmatprep.subr.bf16.mxu0 %v146_v1  ;;  %v16_v3 = vld [vmem:[%s193_s0] sm:$0x1]  ;;  %vm33_vm1 = vcmask 261120   ;;  %s148_s20 = smov [#allocation2]  }
   0x4   :  { %v105_v5 = vld [vmem:[%s195_s2] ss:$0 sm:$0xff]  ;;  %s94_s21 = sshll.u32 %s148_s20, 4  ;;  %vm86_vm2 = vcmask 123904   ;;  %s95_s21 = int_to_ptr.vmem [resolvable:$true] %s94_s21 }
   0x5   :  { %s122_s1 = scalar_lea.vmem %s95_s21, 32  ;;  %p127_p1 = scmp.lt.s32.totalorder %s95_s21, %s95_s21 }
   0x6   :  { %112 = vmatpush3.bf16.msra.mxu0 %v121_v2  ;;  %p123_p0 = scmp.ne.s32.totalorder %s95_s21, %s122_s1  ;;  %p128_p2 = scmp.lt.s32.totalorder %s122_s1, %s122_s1 }
   0x8   :  { %p129_p3 = por %p128_p2, %p127_p1 }
   0x9   :  { %114 = vmatmul.mubr.msk.bf16.vlgmr.msra.gmra.mrb[0].mxu0 %vm33_vm1, %v16_v3 }
   0xa   :  { %p130_p4 = pnand %p129_p3, %p123_p0 }
  0xdc   :  { %v71_v4 = vpop.f32.mrb[0].mxu0 }
  0xdd   :  { %v77_v6 = vmul.f32 0.25, %v71_v4  ;;  %v115_v7 = vpop.f32.mrb[1].mxu0 }
  0xde   :  { %v74_v8 = vpop.f32.mrb[2].mxu0 }
  0xdf   :  { %v85_v9 = vadd.f32 %v105_v5, %v77_v6  ;;  %v116_v10 = vpop.f32.mrb[3].mxu0 }
  0xe1   :  { %87 = vst.msk [vmem:[#allocation2] sm:$0x3] %vm86_vm2, %v85_v9 }
  0xe2   :  { %133 = shalt.err (!%p130_p4)
}
  0xe3   :  { %s134_s2 = scalar_lea.hbm %s196_s3, 32 }
  0xe4   :  { %p135_p5 = scmp.ne.s32.totalorder %s196_s3, %s134_s2  ;;  %p138_p6 = scmp.lt.u32.totalorder %s134_s2, %s196_s3 }
  0xe6   :  { %p140_p7 = pnand %p138_p6, %p135_p5 }
  0xe8   :  { %143 = shalt.err (!%p140_p7)
}
  0xe9   :  { %97 = dma.vmem_to_hbm [thread:$0]  %s95_s21, 32, %s196_s3, [#allocation3]  }
  0xea   :  { %144 = dma.done.wait [#allocation3], 32  }
  0xeb   :  { %145 = vsyncadd [#allocation3], 4294967264 }
  0xec   :  { %101 = vsyncpa [#allocation3], 1 }

</bundles_post_ra>
